<compile_context>
chip_gen: v5e
topology: v5e:2x2
jax: 0.10.0
libtpu: 0.0.40
codegen_flags: <defaults>
</compile_context>

<pallas_src>
import functools
from typing import List, Tuple

import jax
import jax.numpy as jnp
from jax.experimental import pallas as pl
from jax.experimental.pallas import tpu as pltpu

_LANE = 128
_SUBLANE = 8


def _round_up(n: int, m: int) -> int:
    return ((n + m - 1) // m) * m


def _cdiv(a: int, b: int) -> int:
    return (a + b - 1) // b


# ----------------------------------------------------------------------------
# Kernel: a chain of Linear(+Sigmoid) layers for one batch tile, all in VMEM.
# refs = (x_ref, w0_ref, b0_ref, ..., w{L-1}_ref, b{L-1}_ref, out_ref)
# ----------------------------------------------------------------------------
def _fused_mlp_kernel(*refs, num_layers: int, act_last: bool, acts_bf16: bool):
    x_ref = refs[0]
    out_ref = refs[-1]
    wb_refs = refs[1:-1]

    h = x_ref[...]                                   # [tm, in_pad]
    for layer in range(num_layers):
        w = wb_refs[2 * layer][...]                  # [in_pad, out_pad]
        b = wb_refs[2 * layer + 1][...]              # [1, out_pad], f32
        # MXU matmul in the weight dtype (bf16 on the production path),
        # f32 accumulation.
        y = jnp.dot(h.astype(w.dtype), w, preferred_element_type=jnp.float32)
        y = y + b
        is_last = layer == num_layers - 1
        if (not is_last) or act_last:
            # sigmoid(y) = 0.5 * tanh(0.5 * y) + 0.5  -> a single EUP op per
            # element (vs exp + reciprocal) and no exp overflow hazard.
            y = 0.5 * jnp.tanh(0.5 * y) + 0.5
            if acts_bf16 and not is_last:
                # Carry intermediates in bf16 on v6e/v7x: halves vreg/VMEM
                # pressure and makes the next layer's cast a no-op.
                y = y.astype(jnp.bfloat16)
        h = y
    out_ref[...] = h.astype(out_ref.dtype)


# ----------------------------------------------------------------------------
# Parameter init (mirrors torch.nn.Linear default init) and one-time prep.
# ----------------------------------------------------------------------------
def init_mlp_params(key: jax.Array, input_dim: int, n_layers: int,
                    n_neurons: List[int], output_dim: int
                    ) -> List[Tuple[jax.Array, jax.Array]]:
    assert len(n_neurons) == n_layers, (
        "Number of neurons in each hidden layer must equal Number of hidden layers")
    dims = [input_dim] + list(n_neurons) + [output_dim]
    params = []
    for fan_in, fan_out in zip(dims[:-1], dims[1:]):
        key, kw, kb = jax.random.split(key, 3)
        bound = 1.0 / (fan_in ** 0.5)
        w = jax.random.uniform(kw, (fan_in, fan_out), jnp.float32, -bound, bound)
        b = jax.random.uniform(kb, (fan_out,), jnp.float32, -bound, bound)
        params.append((w, b))
    return params


def prepare_params(params: List[Tuple[jax.Array, jax.Array]],
                   *, use_bf16: bool = True
                   ) -> List[Tuple[jax.Array, jax.Array]]:
    """One-time preprocessing, hoisted out of the forward path.

    Zero-pads every layer's input AND output dims to multiples of 128 lanes
    (padded activation lanes are killed by zero weight rows in the next layer,
    so real outputs are exact), stores bias as [1, out_pad], and casts weights
    to bf16 on the production path (MXU-native dtype on v5e/v6e/v7x)."""
    prepped = []
    prev_out_pad = None
    for idx, (w, b) in enumerate(params):
        fan_in, fan_out = w.shape
        in_pad = _round_up(fan_in, _LANE) if idx == 0 else prev_out_pad
        out_pad = _round_up(fan_out, _LANE)
        w_p = jnp.zeros((in_pad, out_pad), jnp.float32).at[:fan_in, :fan_out].set(w)
        b_p = jnp.zeros((1, out_pad), jnp.float32).at[:, :fan_out].set(b.reshape(1, -1))
        if use_bf16:
            w_p = w_p.astype(jnp.bfloat16)
        prepped.append((w_p, b_p))
        prev_out_pad = out_pad
    return prepped


# ----------------------------------------------------------------------------
# VMEM budgeting / tiling helpers.
# ----------------------------------------------------------------------------
def _vmem_capacity_bytes() -> int:
    try:
        cap = int(pltpu.get_tpu_info().vmem_capacity_bytes)
        if cap > 0:
            return cap
    except Exception:
        pass
    return 64 << 20   # conservative floor: v7x per-TensorCore VMEM


def _required_vmem_bytes(tm: int, group) -> int:
    # Params are single-buffered (constant-index + Buffered(1)).
    param_bytes = sum(w.size * w.dtype.itemsize + b.size * b.dtype.itemsize
                      for w, b in group)
    gin = group[0][0].shape[0]
    gout = group[-1][0].shape[1]
    max_width = max(max(w.shape) for w, _ in group)
    io_bytes = 2 * tm * (gin + gout) * 4      # double-buffered x / out tiles
    act_bytes = 2 * tm * max_width * 4        # intermediates + headroom
    return param_bytes + io_bytes + act_bytes


def _segment_layers(prepped, max_param_bytes: int):
    """Greedily split the layer chain so each group's params fit in VMEM."""
    groups, cur, cur_bytes = [], [], 0
    for (w, b) in prepped:
        sz = w.size * w.dtype.itemsize + b.size * b.dtype.itemsize
        if cur and cur_bytes + sz > max_param_bytes:
            groups.append(cur)
            cur, cur_bytes = [], 0
        cur.append((w, b))
        cur_bytes += sz
    groups.append(cur)
    return groups


def _pick_tile_rows(batch: int, tile_rows: int) -> int:
    n_tiles = max(1, _cdiv(batch, max(tile_rows, _SUBLANE)))
    # Give both v7x TensorCores a tile when the batch is big enough.
    if batch >= 2 * _LANE:
        if n_tiles == 1:
            n_tiles = 2
        elif n_tiles % 2 == 1:
            n_tiles += 1
    # Balanced tile: padding waste < 8 rows per tile.
    tm = _round_up(_cdiv(batch, n_tiles), _SUBLANE)
    # Prefer MXU-aligned 128-row tiles when that adds no extra padding.
    tm128 = _round_up(tm, _LANE)
    if _round_up(batch, tm128) <= _round_up(batch, tm):
        tm = tm128
    return tm


# ----------------------------------------------------------------------------
# One fused pallas_call over a contiguous group of layers.
# ----------------------------------------------------------------------------
def _call_group(x_pad, group, *, act_last: bool, tm: int, grid: int,
                vmem_bytes: int):
    in_pad = group[0][0].shape[0]
    out_pad = group[-1][0].shape[1]
    acts_bf16 = group[0][0].dtype == jnp.bfloat16
    kernel = functools.partial(_fused_mlp_kernel, num_layers=len(group),
                               act_last=act_last, acts_bf16=acts_bf16)

    def build(single_buffer_params: bool):
        operands = [x_pad]
        in_specs = [pl.BlockSpec((tm, in_pad), lambda i: (i, 0))]
        for w, b in group:
            operands += [w, b]
            if single_buffer_params:
                # Constant-index blocks are fetched once; single-buffer them so
                # resident params cost 1x (not 2x) their size in VMEM.
                in_specs += [
                    pl.BlockSpec(w.shape, lambda i: (0, 0),
                                 pipeline_mode=pl.Buffered(1)),
                    pl.BlockSpec(b.shape, lambda i: (0, 0),
                                 pipeline_mode=pl.Buffered(1)),
                ]
            else:
                in_specs += [pl.BlockSpec(w.shape, lambda i: (0, 0)),
                             pl.BlockSpec(b.shape, lambda i: (0, 0))]

        return pl.pallas_call(
            kernel,
            out_shape=jax.ShapeDtypeStruct((x_pad.shape[0], out_pad), jnp.float32),
            grid_spec=pltpu.PrefetchScalarGridSpec(
                num_scalar_prefetch=0,
                grid=(grid,),
                in_specs=in_specs,
                out_specs=pl.BlockSpec((tm, out_pad), lambda i: (i, 0)),
            ),
            compiler_params=pltpu.CompilerParams(
                dimension_semantics=("parallel",),   # batch tiles across TCs (v7x)
                vmem_limit_bytes=int(vmem_bytes)),
        )(*operands)

    try:
        return build(single_buffer_params=True)
    except Exception:
        # Fallback if this jax build rejects pipeline_mode on input BlockSpecs.
        return build(single_buffer_params=False)


# ----------------------------------------------------------------------------
# Forward: fused pallas_call(s), batch-tiled grid, VMEM-resident weights.
# ----------------------------------------------------------------------------
def mlp_forward(x: jax.Array,
                prepped: List[Tuple[jax.Array, jax.Array]],
                output_dim: int,
                *, tile_rows: int = 1024) -> jax.Array:
    batch, in_dim = x.shape
    in_pad = prepped[0][0].shape[0]
    assert in_dim <= in_pad

    # Lane-pad the input features once (zero weight rows keep this exact).
    if in_dim != in_pad:
        x = jnp.pad(x, ((0, 0), (0, in_pad - in_dim)))

    cap = _vmem_capacity_bytes()
    budget = min(int(0.85 * cap), cap - (4 << 20))

    # Graceful fallback for very wide MLPs: segment the layer chain so each
    # group's resident parameters fit comfortably in VMEM.
    groups = _segment_layers(prepped, int(0.6 * budget))
    # TODO(synk): for a single layer wider than VMEM, stream weight column
    # tiles (memory_space=pl.ANY + make_async_copy) instead of segmenting.

    # Pick the batch tile, then back it off until everything fits in VMEM.
    tm = _pick_tile_rows(batch, tile_rows)
    while tm > _SUBLANE and any(_required_vmem_bytes(tm, g) > budget
                                for g in groups):
        tm = max(_SUBLANE, _round_up(tm // 2, _SUBLANE))

    padded_batch = _round_up(batch, tm)
    if padded_batch != batch:
        x = jnp.pad(x, ((0, padded_batch - batch), (0, 0)))
    grid = padded_batch // tm

    h = x
    for gi, group in enumerate(groups):
        final = gi == len(groups) - 1
        h = _call_group(h, group, act_last=not final, tm=tm, grid=grid,
                        vmem_bytes=budget)

    return h[:batch, :output_dim]


def mlp_reference(x, params):
    """Pure-JAX reference (unpadded f32 parameters) for correctness checking."""
    h = x
    for i, (w, b) in enumerate(params):
        h = h @ w + b
        if i != len(params) - 1:
            h = jax.nn.sigmoid(h)
    return h


if __name__ == "__main__":
    # Small synthetic configuration consistent with the module's constructor.
    input_dim = 16
    n_layers = 2
    n_neurons = [32, 32]
    output_dim = 8
    batch = 8

    key = jax.random.PRNGKey(0)
    key, kx = jax.random.split(key)
    x = jax.random.normal(kx, (batch, input_dim), dtype=jnp.float32)

    params = init_mlp_params(key, input_dim, n_layers, n_neurons, output_dim)
    ref = jax.block_until_ready(mlp_reference(x, params))

    # Exact-check path: f32 weights (sigmoid via tanh is exact, no approx ops).
    prepped_f32 = prepare_params(params, use_bf16=False)
    out_f32 = jax.block_until_ready(mlp_forward(x, prepped_f32, output_dim))
    assert out_f32.shape == (batch, output_dim)
    assert jnp.allclose(out_f32, ref, atol=1e-4, rtol=1e-4), "f32 mismatch vs reference"

    # Production path: bf16 weights + bf16 intermediates, f32 accumulation.
    prepped_bf16 = prepare_params(params, use_bf16=True)
    out_bf16 = jax.block_until_ready(mlp_forward(x, prepped_bf16, output_dim))
    assert out_bf16.shape == (batch, output_dim)
    assert jnp.allclose(out_bf16, ref, atol=3e-2, rtol=3e-2), "bf16 mismatch vs reference"

    print("KERNEL_OK")
</pallas_src>

<mosaic_0001>
module attributes {stable_mosaic.version = 11 : i64} {
  func.func @_fused_mlp_kernel(%arg0: i32, %arg1: memref<8x128xf32, #tpu.memory_space<vmem>>, %arg2: memref<128x128xf32, #tpu.memory_space<vmem>>, %arg3: memref<1x128xf32, #tpu.memory_space<vmem>>, %arg4: memref<128x128xf32, #tpu.memory_space<vmem>>, %arg5: memref<1x128xf32, #tpu.memory_space<vmem>>, %arg6: memref<128x128xf32, #tpu.memory_space<vmem>>, %arg7: memref<1x128xf32, #tpu.memory_space<vmem>>, %arg8: memref<8x128xf32, #tpu.memory_space<vmem>>) attributes {dimension_semantics = [#tpu.dimension_semantics<parallel>], iteration_bounds = array<i64: 1>, scalar_prefetch = 0 : i64, scratch_operands = 0 : i64, tpu.core_type = #tpu.core_type<tc>, window_params = [{transform_indices = @transform_0, window_bounds = array<i64: 8, 128>}, {pipeline_mode = #tpu.pipeline_mode<synchronous>, transform_indices = @transform_1, window_bounds = array<i64: 128, 128>}, {pipeline_mode = #tpu.pipeline_mode<synchronous>, transform_indices = @transform_2, window_bounds = array<i64: 1, 128>}, {pipeline_mode = #tpu.pipeline_mode<synchronous>, transform_indices = @transform_3, window_bounds = array<i64: 128, 128>}, {pipeline_mode = #tpu.pipeline_mode<synchronous>, transform_indices = @transform_4, window_bounds = array<i64: 1, 128>}, {pipeline_mode = #tpu.pipeline_mode<synchronous>, transform_indices = @transform_5, window_bounds = array<i64: 128, 128>}, {pipeline_mode = #tpu.pipeline_mode<synchronous>, transform_indices = @transform_6, window_bounds = array<i64: 1, 128>}, {transform_indices = @transform_7, window_bounds = array<i64: 8, 128>}]} {
    %c0 = arith.constant 0 : index
    %c0_0 = arith.constant 0 : index
    %0 = vector.load %arg1[%c0, %c0_0] : memref<8x128xf32, #tpu.memory_space<vmem>>, vector<8x128xf32>
    %c0_1 = arith.constant 0 : index
    %c0_2 = arith.constant 0 : index
    %1 = vector.load %arg2[%c0_1, %c0_2] : memref<128x128xf32, #tpu.memory_space<vmem>>, vector<128x128xf32>
    %c0_3 = arith.constant 0 : index
    %c0_4 = arith.constant 0 : index
    %2 = vector.load %arg3[%c0_3, %c0_4] : memref<1x128xf32, #tpu.memory_space<vmem>>, vector<1x128xf32>
    %cst = arith.constant dense<0.000000e+00> : vector<8x128xf32>
    %3 = tpu.matmul %0, %1, %cst {dimension_numbers = #tpu.dot_dimension_numbers<[1], [0], [0], [1], [0, 0, 1, 1], [], []>} : vector<8x128xf32>, vector<128x128xf32>, vector<8x128xf32> -> vector<8x128xf32>
    %4 = vector.broadcast %2 : vector<1x128xf32> to vector<8x128xf32>
    %5 = arith.addf %3, %4 : vector<8x128xf32>
    %cst_5 = arith.constant 5.000000e-01 : f32
    %6 = vector.broadcast %cst_5 : f32 to vector<8x128xf32>
    %7 = arith.mulf %6, %5 : vector<8x128xf32>
    %8 = math.tanh %7 : vector<8x128xf32>
    %cst_6 = arith.constant 5.000000e-01 : f32
    %9 = vector.broadcast %cst_6 : f32 to vector<8x128xf32>
    %10 = arith.mulf %9, %8 : vector<8x128xf32>
    %cst_7 = arith.constant 5.000000e-01 : f32
    %11 = vector.broadcast %cst_7 : f32 to vector<8x128xf32>
    %12 = arith.addf %10, %11 : vector<8x128xf32>
    %c0_8 = arith.constant 0 : index
    %c0_9 = arith.constant 0 : index
    %13 = vector.load %arg4[%c0_8, %c0_9] : memref<128x128xf32, #tpu.memory_space<vmem>>, vector<128x128xf32>
    %c0_10 = arith.constant 0 : index
    %c0_11 = arith.constant 0 : index
    %14 = vector.load %arg5[%c0_10, %c0_11] : memref<1x128xf32, #tpu.memory_space<vmem>>, vector<1x128xf32>
    %cst_12 = arith.constant dense<0.000000e+00> : vector<8x128xf32>
    %15 = tpu.matmul %12, %13, %cst_12 {dimension_numbers = #tpu.dot_dimension_numbers<[1], [0], [0], [1], [0, 0, 1, 1], [], []>} : vector<8x128xf32>, vector<128x128xf32>, vector<8x128xf32> -> vector<8x128xf32>
    %16 = vector.broadcast %14 : vector<1x128xf32> to vector<8x128xf32>
    %17 = arith.addf %15, %16 : vector<8x128xf32>
    %cst_13 = arith.constant 5.000000e-01 : f32
    %18 = vector.broadcast %cst_13 : f32 to vector<8x128xf32>
    %19 = arith.mulf %18, %17 : vector<8x128xf32>
    %20 = math.tanh %19 : vector<8x128xf32>
    %cst_14 = arith.constant 5.000000e-01 : f32
    %21 = vector.broadcast %cst_14 : f32 to vector<8x128xf32>
    %22 = arith.mulf %21, %20 : vector<8x128xf32>
    %cst_15 = arith.constant 5.000000e-01 : f32
    %23 = vector.broadcast %cst_15 : f32 to vector<8x128xf32>
    %24 = arith.addf %22, %23 : vector<8x128xf32>
    %c0_16 = arith.constant 0 : index
    %c0_17 = arith.constant 0 : index
    %25 = vector.load %arg6[%c0_16, %c0_17] : memref<128x128xf32, #tpu.memory_space<vmem>>, vector<128x128xf32>
    %c0_18 = arith.constant 0 : index
    %c0_19 = arith.constant 0 : index
    %26 = vector.load %arg7[%c0_18, %c0_19] : memref<1x128xf32, #tpu.memory_space<vmem>>, vector<1x128xf32>
    %cst_20 = arith.constant dense<0.000000e+00> : vector<8x128xf32>
    %27 = tpu.matmul %24, %25, %cst_20 {dimension_numbers = #tpu.dot_dimension_numbers<[1], [0], [0], [1], [0, 0, 1, 1], [], []>} : vector<8x128xf32>, vector<128x128xf32>, vector<8x128xf32> -> vector<8x128xf32>
    %28 = vector.broadcast %26 : vector<1x128xf32> to vector<8x128xf32>
    %29 = arith.addf %27, %28 : vector<8x128xf32>
    %c0_21 = arith.constant 0 : index
    %c0_22 = arith.constant 0 : index
    %30 = vector.load %arg8[%c0_21, %c0_22] : memref<8x128xf32, #tpu.memory_space<vmem>>, vector<8x128xf32>
    tpu.vector_store %arg8[%c0_21, %c0_22], %29 {strides = array<i32>} : memref<8x128xf32, #tpu.memory_space<vmem>>, vector<8x128xf32>,
    return
  }
  func.func @transform_0(%arg0: i32) -> (i32, i32) {
    %c0_i32 = arith.constant 0 : i32
    %c0_i32_0 = arith.constant 0 : i32
    return %arg0, %c0_i32 : i32, i32
  }
  func.func @transform_1(%arg0: i32) -> (i32, i32) {
    %c0_i32 = arith.constant 0 : i32
    %c0_i32_0 = arith.constant 0 : i32
    %c0_i32_1 = arith.constant 0 : i32
    return %c0_i32, %c0_i32_0 : i32, i32
  }
  func.func @transform_2(%arg0: i32) -> (i32, i32) {
    %c0_i32 = arith.constant 0 : i32
    %c0_i32_0 = arith.constant 0 : i32
    %c0_i32_1 = arith.constant 0 : i32
    return %c0_i32, %c0_i32_0 : i32, i32
  }
  func.func @transform_3(%arg0: i32) -> (i32, i32) {
    %c0_i32 = arith.constant 0 : i32
    %c0_i32_0 = arith.constant 0 : i32
    %c0_i32_1 = arith.constant 0 : i32
    return %c0_i32, %c0_i32_0 : i32, i32
  }
  func.func @transform_4(%arg0: i32) -> (i32, i32) {
    %c0_i32 = arith.constant 0 : i32
    %c0_i32_0 = arith.constant 0 : i32
    %c0_i32_1 = arith.constant 0 : i32
    return %c0_i32, %c0_i32_0 : i32, i32
  }
  func.func @transform_5(%arg0: i32) -> (i32, i32) {
    %c0_i32 = arith.constant 0 : i32
    %c0_i32_0 = arith.constant 0 : i32
    %c0_i32_1 = arith.constant 0 : i32
    return %c0_i32, %c0_i32_0 : i32, i32
  }
  func.func @transform_6(%arg0: i32) -> (i32, i32) {
    %c0_i32 = arith.constant 0 : i32
    %c0_i32_0 = arith.constant 0 : i32
    %c0_i32_1 = arith.constant 0 : i32
    return %c0_i32, %c0_i32_0 : i32, i32
  }
  func.func @transform_7(%arg0: i32) -> (i32, i32) {
    %c0_i32 = arith.constant 0 : i32
    %c0_i32_0 = arith.constant 0 : i32
    return %arg0, %c0_i32 : i32, i32
  }
}

module attributes {stable_mosaic.version = 11 : i64} {
  func.func @_fused_mlp_kernel(%arg0: i32, %arg1: memref<8x128xf32, #tpu.memory_space<vmem>>, %arg2: memref<128x128xf32, #tpu.memory_space<vmem>>, %arg3: memref<1x128xf32, #tpu.memory_space<vmem>>, %arg4: memref<128x128xf32, #tpu.memory_space<vmem>>, %arg5: memref<1x128xf32, #tpu.memory_space<vmem>>, %arg6: memref<128x128xf32, #tpu.memory_space<vmem>>, %arg7: memref<1x128xf32, #tpu.memory_space<vmem>>, %arg8: memref<8x128xf32, #tpu.memory_space<vmem>>) attributes {dimension_semantics = [#tpu.dimension_semantics<parallel>], iteration_bounds = array<i64: 1>, scalar_prefetch = 0 : i64, scratch_operands = 0 : i64, tpu.core_type = #tpu.core_type<tc>, window_params = [{transform_indices = @transform_0, window_bounds = array<i64: 8, 128>}, {pipeline_mode = #tpu.pipeline_mode<synchronous>, transform_indices = @transform_1, window_bounds = array<i64: 128, 128>}, {pipeline_mode = #tpu.pipeline_mode<synchronous>, transform_indices = @transform_2, window_bounds = array<i64: 1, 128>}, {pipeline_mode = #tpu.pipeline_mode<synchronous>, transform_indices = @transform_3, window_bounds = array<i64: 128, 128>}, {pipeline_mode = #tpu.pipeline_mode<synchronous>, transform_indices = @transform_4, window_bounds = array<i64: 1, 128>}, {pipeline_mode = #tpu.pipeline_mode<synchronous>, transform_indices = @transform_5, window_bounds = array<i64: 128, 128>}, {pipeline_mode = #tpu.pipeline_mode<synchronous>, transform_indices = @transform_6, window_bounds = array<i64: 1, 128>}, {transform_indices = @transform_7, window_bounds = array<i64: 8, 128>}]} {
    %c0 = arith.constant 0 : index
    %c0_0 = arith.constant 0 : index
    %0 = vector.load %arg1[%c0, %c0_0] : memref<8x128xf32, #tpu.memory_space<vmem>>, vector<8x128xf32>
    %c0_1 = arith.constant 0 : index
    %c0_2 = arith.constant 0 : index
    %1 = vector.load %arg2[%c0_1, %c0_2] : memref<128x128xf32, #tpu.memory_space<vmem>>, vector<128x128xf32>
    %c0_3 = arith.constant 0 : index
    %c0_4 = arith.constant 0 : index
    %2 = vector.load %arg3[%c0_3, %c0_4] : memref<1x128xf32, #tpu.memory_space<vmem>>, vector<1x128xf32>
    %cst = arith.constant dense<0.000000e+00> : vector<8x128xf32>
    %3 = tpu.matmul %0, %1, %cst {dimension_numbers = #tpu.dot_dimension_numbers<[1], [0], [0], [1], [0, 0, 1, 1], [], []>} : vector<8x128xf32>, vector<128x128xf32>, vector<8x128xf32> -> vector<8x128xf32>
    %4 = vector.broadcast %2 : vector<1x128xf32> to vector<8x128xf32>
    %5 = arith.addf %3, %4 : vector<8x128xf32>
    %cst_5 = arith.constant 5.000000e-01 : f32
    %6 = vector.broadcast %cst_5 : f32 to vector<8x128xf32>
    %7 = arith.mulf %6, %5 : vector<8x128xf32>
    %8 = math.tanh %7 : vector<8x128xf32>
    %cst_6 = arith.constant 5.000000e-01 : f32
    %9 = vector.broadcast %cst_6 : f32 to vector<8x128xf32>
    %10 = arith.mulf %9, %8 : vector<8x128xf32>
    %cst_7 = arith.constant 5.000000e-01 : f32
    %11 = vector.broadcast %cst_7 : f32 to vector<8x128xf32>
    %12 = arith.addf %10, %11 : vector<8x128xf32>
    %c0_8 = arith.constant 0 : index
    %c0_9 = arith.constant 0 : index
    %13 = vector.load %arg4[%c0_8, %c0_9] : memref<128x128xf32, #tpu.memory_space<vmem>>, vector<128x128xf32>
    %c0_10 = arith.constant 0 : index
    %c0_11 = arith.constant 0 : index
    %14 = vector.load %arg5[%c0_10, %c0_11] : memref<1x128xf32, #tpu.memory_space<vmem>>, vector<1x128xf32>
    %cst_12 = arith.constant dense<0.000000e+00> : vector<8x128xf32>
    %15 = tpu.matmul %12, %13, %cst_12 {dimension_numbers = #tpu.dot_dimension_numbers<[1], [0], [0], [1], [0, 0, 1, 1], [], []>} : vector<8x128xf32>, vector<128x128xf32>, vector<8x128xf32> -> vector<8x128xf32>
    %16 = vector.broadcast %14 : vector<1x128xf32> to vector<8x128xf32>
    %17 = arith.addf %15, %16 : vector<8x128xf32>
    %cst_13 = arith.constant 5.000000e-01 : f32
    %18 = vector.broadcast %cst_13 : f32 to vector<8x128xf32>
    %19 = arith.mulf %18, %17 : vector<8x128xf32>
    %20 = math.tanh %19 : vector<8x128xf32>
    %cst_14 = arith.constant 5.000000e-01 : f32
    %21 = vector.broadcast %cst_14 : f32 to vector<8x128xf32>
    %22 = arith.mulf %21, %20 : vector<8x128xf32>
    %cst_15 = arith.constant 5.000000e-01 : f32
    %23 = vector.broadcast %cst_15 : f32 to vector<8x128xf32>
    %24 = arith.addf %22, %23 : vector<8x128xf32>
    %c0_16 = arith.constant 0 : index
    %c0_17 = arith.constant 0 : index
    %25 = vector.load %arg6[%c0_16, %c0_17] : memref<128x128xf32, #tpu.memory_space<vmem>>, vector<128x128xf32>
    %c0_18 = arith.constant 0 : index
    %c0_19 = arith.constant 0 : index
    %26 = vector.load %arg7[%c0_18, %c0_19] : memref<1x128xf32, #tpu.memory_space<vmem>>, vector<1x128xf32>
    %cst_20 = arith.constant dense<0.000000e+00> : vector<8x128xf32>
    %27 = tpu.matmul %24, %25, %cst_20 {dimension_numbers = #tpu.dot_dimension_numbers<[1], [0], [0], [1], [0, 0, 1, 1], [], []>} : vector<8x128xf32>, vector<128x128xf32>, vector<8x128xf32> -> vector<8x128xf32>
    %28 = vector.broadcast %26 : vector<1x128xf32> to vector<8x128xf32>
    %29 = arith.addf %27, %28 : vector<8x128xf32>
    %c0_21 = arith.constant 0 : index
    %c0_22 = arith.constant 0 : index
    %30 = vector.load %arg8[%c0_21, %c0_22] : memref<8x128xf32, #tpu.memory_space<vmem>>, vector<8x128xf32>
    tpu.vector_store %arg8[%c0_21, %c0_22], %29 {strides = array<i32>} : memref<8x128xf32, #tpu.memory_space<vmem>>, vector<8x128xf32>,
    return
  }
  func.func @transform_0(%arg0: i32) -> (i32, i32) {
    %c0_i32 = arith.constant 0 : i32
    %c0_i32_0 = arith.constant 0 : i32
    return %arg0, %c0_i32 : i32, i32
  }
  func.func @transform_1(%arg0: i32) -> (i32, i32) {
    %c0_i32 = arith.constant 0 : i32
    %c0_i32_0 = arith.constant 0 : i32
    %c0_i32_1 = arith.constant 0 : i32
    return %c0_i32, %c0_i32_0 : i32, i32
  }
  func.func @transform_2(%arg0: i32) -> (i32, i32) {
    %c0_i32 = arith.constant 0 : i32
    %c0_i32_0 = arith.constant 0 : i32
    %c0_i32_1 = arith.constant 0 : i32
    return %c0_i32, %c0_i32_0 : i32, i32
  }
  func.func @transform_3(%arg0: i32) -> (i32, i32) {
    %c0_i32 = arith.constant 0 : i32
    %c0_i32_0 = arith.constant 0 : i32
    %c0_i32_1 = arith.constant 0 : i32
    return %c0_i32, %c0_i32_0 : i32, i32
  }
  func.func @transform_4(%arg0: i32) -> (i32, i32) {
    %c0_i32 = arith.constant 0 : i32
    %c0_i32_0 = arith.constant 0 : i32
    %c0_i32_1 = arith.constant 0 : i32
    return %c0_i32, %c0_i32_0 : i32, i32
  }
  func.func @transform_5(%arg0: i32) -> (i32, i32) {
    %c0_i32 = arith.constant 0 : i32
    %c0_i32_0 = arith.constant 0 : i32
    %c0_i32_1 = arith.constant 0 : i32
    return %c0_i32, %c0_i32_0 : i32, i32
  }
  func.func @transform_6(%arg0: i32) -> (i32, i32) {
    %c0_i32 = arith.constant 0 : i32
    %c0_i32_0 = arith.constant 0 : i32
    %c0_i32_1 = arith.constant 0 : i32
    return %c0_i32, %c0_i32_0 : i32, i32
  }
  func.func @transform_7(%arg0: i32) -> (i32, i32) {
    %c0_i32 = arith.constant 0 : i32
    %c0_i32_0 = arith.constant 0 : i32
    return %arg0, %c0_i32 : i32, i32
  }
}

</mosaic_0001>

<bundles_post_ra>
// kernel: tpu_custom_call.1
= control target key start
LH: loop header
LB: loop body
LE: loop exit
PB: predicated region body
PF: predicated region fallthrough
CT: control target
= control target key end

     0   :  { %12 = vsyncpa [#allocation3], 0  ;;  %s450_s0 = inlined_call_operand.hbm [shape: f32[8,128], index: 0, kind: input, shape index: {}]   ;;  %s451_s1 = inlined_call_operand.hbm [shape: f32[128,128], index: 1, kind: input, shape index: {}]   ;;  %s452_s2 = inlined_call_operand.vmem [shape: f32[1,128], index: 2, kind: input, shape index: {}]   ;;  %s453_s3 = inlined_call_operand.hbm [shape: f32[128,128], index: 3, kind: input, shape index: {}]   ;;  %s454_s4 = inlined_call_operand.vmem [shape: f32[1,128], index: 4, kind: input, shape index: {}]   ;;  %s455_s5 = inlined_call_operand.hbm [shape: f32[128,128], index: 5, kind: input, shape index: {}]   ;;  %s456_s6 = inlined_call_operand.vmem [shape: f32[1,128], index: 6, kind: input, shape index: {}]   ;;  %s457_s7 = inlined_call_operand.hbm [shape: f32[8,128], index: 7, kind: output, shape index: {}]  }
   0x1   :  { %13 = vsyncpa [#allocation6], 0 }
   0x2   :  { %14 = vsyncpa [#allocation9], 0  ;;  %s31_s26 = sshll.u32 %s451_s1, 4  ;;  %s32_s26 = int_to_ptr.hbm [resolvable:$true] %s31_s26 }
   0x3   :  { %15 = vsyncpa [#allocation4], 0  ;;  %s379_s27 = smov [#allocation5]   ;;  %s21_s8 = sshll.u32 %s450_s0, 4  ;;  %s22_s8 = int_to_ptr.hbm [resolvable:$true] %s21_s8 }
   0x4   :  { %s33_s28 = sshll.u32 %s379_s27, 4  ;;  %s380_s9 = smov 128   ;;  %s34_s28 = int_to_ptr.vmem [resolvable:$true] %s33_s28 }
   0x5   :  { %s381_s10 = smov 8   ;;  %s382_s11 = smov [#allocation2]  }
   0x6   :  { %39 = dma.hbm_to_vmem [thread:$0]  %s32_s26, 2048, %s34_s28, [#allocation6], %s380_s9, %s380_s9, %s381_s10  }
   0x7   :  { %s23_s12 = sshll.u32 %s382_s11, 4  ;;  %s46_s15 = sshll.u32 %s453_s3, 4  ;;  %s24_s12 = int_to_ptr.vmem [resolvable:$true] %s23_s12  ;;  %s47_s15 = int_to_ptr.hbm [resolvable:$true] %s46_s15 }
   0x8   :  { %26 = dma.hbm_to_vmem [thread:$0]  %s22_s8, 128, %s24_s12, [#allocation3]  }
   0x9   :  { %s61_s17 = sshll.u32 %s455_s5, 4  ;;  %s383_s18 = smov [#allocation7]   ;;  %s62_s17 = int_to_ptr.hbm [resolvable:$true] %s61_s17 }
   0xa   :  { %s48_s19 = sshll.u32 %s383_s18, 4  ;;  %s384_s0 = smov [#allocation8]   ;;  %s49_s19 = int_to_ptr.vmem [resolvable:$true] %s48_s19 }
   0xb   :  { %54 = dma.hbm_to_vmem [thread:$0]  %s47_s15, 2048, %s49_s19, [#allocation6], %s380_s9, %s380_s9, %s381_s10  }
   0xc   :  { %s63_s20 = sshll.u32 %s384_s0, 4  ;;  %s64_s20 = int_to_ptr.vmem [resolvable:$true] %s63_s20 }
   0xd   :  { %69 = dma.hbm_to_vmem [thread:$0]  %s62_s17, 2048, %s64_s20, [#allocation9], %s380_s9, %s380_s9, %s381_s10  }
   0xe   :  { %371 = dma.done.wait [#allocation3], 128  }
   0xf   :  { %372 = vsyncadd [#allocation3], 4294967168 }
  0x10   :  { %373 = dma.done.wait [#allocation6], 4096  }
  0x11   :  { %374 = vsyncadd [#allocation6], 4294963200 }
  0x12   :  { %375 = dma.done.wait [#allocation9], 2048  }
  0x13   :  { %376 = vsyncadd [#allocation9], 4294965248  ;;  %v104_v0 = vld [vmem:[#allocation5 + $0x78] sm:$0xff]  ;;  %v103_v1 = vld [vmem:[#allocation5 + $0x70] sm:$0xff]  ;;  %s385_s24 = smov [#allocation10]   ;;  %s225_s28 = sshll.u32 %s457_s7, 4  ;;  %s226_s28 = int_to_ptr.hbm [resolvable:$true] %s225_s28 }
  0x14   :  { %109 = vmatpush.msra.mxu0 %v104_v0  ;;  %v102_v2 = vld [vmem:[#allocation5 + $0x68] sm:$0xff]  ;;  %v101_v3 = vld [vmem:[#allocation5 + $0x60] sm:$0xff]  ;;  %v148_v4 = vld [vmem:[#allocation7 + $0x78] sm:$0xff]  ;;  %s223_s25 = sshll.u32 %s385_s24, 4  ;;  %s224_s25 = int_to_ptr.vmem [resolvable:$true] %s223_s25 }
  0x15   :  { %v100_v5 = vld [vmem:[#allocation5 + $0x58] sm:$0xff]  ;;  %153 = vmatpush.msra.mxu1 %v148_v4  ;;  %v147_v6 = vld [vmem:[#allocation7 + $0x70] sm:$0xff]  ;;  %v146_v7 = vld [vmem:[#allocation7 + $0x68] sm:$0xff] }
  0x16   :  { %110 = vmatpush.msra.mxu0 %v103_v1  ;;  %v99_v8 = vld [vmem:[#allocation5 + $0x50] sm:$0xff]  ;;  %v145_v9 = vld [vmem:[#allocation7 + $0x60] sm:$0xff]  ;;  %v98_v10 = vld [vmem:[#allocation5 + $0x48] sm:$0xff] }
  0x17   :  { %154 = vmatpush.msra.mxu1 %v147_v6  ;;  %v144_v11 = vld [vmem:[#allocation7 + $0x58] sm:$0xff]  ;;  %v97_v12 = vld [vmem:[#allocation5 + $0x40] sm:$0xff]  ;;  %v143_v13 = vld [vmem:[#allocation7 + $0x50] sm:$0xff] }
  0x18   :  { %111 = vmatpush.msra.mxu0 %v102_v2  ;;  %v96_v14 = vld [vmem:[#allocation5 + $0x38] sm:$0xff]  ;;  %v142_v15 = vld [vmem:[#allocation7 + $0x48] sm:$0xff]  ;;  %v95_v16 = vld [vmem:[#allocation5 + $0x30] sm:$0xff] }
  0x19   :  { %155 = vmatpush.msra.mxu1 %v146_v7  ;;  %v141_v17 = vld [vmem:[#allocation7 + $0x40] sm:$0xff]  ;;  %v94_v18 = vld [vmem:[#allocation5 + $0x28] sm:$0xff]  ;;  %v92_v20 = vld [vmem:[#allocation5 + $0x18] sm:$0xff] }
  0x1a   :  { %112 = vmatpush.msra.mxu0 %v101_v3  ;;  %v93_v19 = vld [vmem:[#allocation5 + $0x20] sm:$0xff]  ;;  %v91_v21 = vld [vmem:[#allocation5 + $0x10] sm:$0xff]  ;;  %v90_v22 = vld [vmem:[#allocation5 + $0x8] sm:$0xff] }
  0x1b   :  { %156 = vmatpush.msra.mxu1 %v145_v9  ;;  %v89_v23 = vld [vmem:[#allocation5] sm:$0xff]  ;;  %v88_v24 = vld [vmem:[#allocation2] sm:$0xff]  ;;  %v139_v26 = vld [vmem:[#allocation7 + $0x30] sm:$0xff] }
  0x1c   :  { %113 = vmatpush.msra.mxu0 %v100_v5  ;;  %v140_v25 = vld [vmem:[#allocation7 + $0x38] sm:$0xff]  ;;  %v138_v27 = vld [vmem:[#allocation7 + $0x28] sm:$0xff]  ;;  %v137_v28 = vld [vmem:[#allocation7 + $0x20] sm:$0xff] }
  0x1d   :  { %157 = vmatpush.msra.mxu1 %v144_v11  ;;  %v136_v29 = vld [vmem:[#allocation7 + $0x18] sm:$0xff]  ;;  %v135_v30 = vld [vmem:[#allocation7 + $0x10] sm:$0xff]  ;;  %v134_v31 = vld [vmem:[#allocation7 + $0x8] sm:$0xff] }
  0x1e   :  { %114 = vmatpush.msra.mxu0 %v99_v8  ;;  %v133_v32 = vld [vmem:[#allocation7] sm:$0xff]  ;;  %v192_v33 = vld [vmem:[#allocation8 + $0x78] sm:$0xff]  ;;  %v191_v34 = vld [vmem:[#allocation8 + $0x70] sm:$0xff] }
  0x1f   :  { %158 = vmatpush.msra.mxu1 %v143_v13  ;;  %197 = vmatpush.msra.mxu2 %v192_v33  ;;  %v190_v35 = vld [vmem:[#allocation8 + $0x68] sm:$0xff]  ;;  %v189_v36 = vld [vmem:[#allocation8 + $0x60] sm:$0xff]  ;;  %v188_v37 = vld [vmem:[#allocation8 + $0x58] sm:$0xff] }
  0x20   :  { %115 = vmatpush.msra.mxu0 %v98_v10  ;;  %v187_v38 = vld [vmem:[#allocation8 + $0x50] sm:$0xff]  ;;  %v186_v39 = vld [vmem:[#allocation8 + $0x48] sm:$0xff]  ;;  %v185_v40 = vld [vmem:[#allocation8 + $0x40] sm:$0xff] }
  0x21   :  { %159 = vmatpush.msra.mxu1 %v142_v15  ;;  %198 = vmatpush.msra.mxu2 %v191_v34  ;;  %v244_v41 = vld [vmem:[%s452_s2] ss:$0 sm:$0xff]  ;;  %v183_v49 = vld [vmem:[#allocation8 + $0x30] sm:$0xff]  ;;  %v182_v50 = vld [vmem:[#allocation8 + $0x28] sm:$0xff] }
  0x22   :  { %116 = vmatpush.msra.mxu0 %v97_v12  ;;  %v184_v48 = vld [vmem:[#allocation8 + $0x38] sm:$0xff]  ;;  %v181_v51 = vld [vmem:[#allocation8 + $0x20] sm:$0xff]  ;;  %v179_v53 = vld [vmem:[#allocation8 + $0x10] sm:$0xff] }
  0x23   :  { %160 = vmatpush.msra.mxu1 %v141_v17  ;;  %199 = vmatpush.msra.mxu2 %v190_v35  ;;  %v180_v52 = vld [vmem:[#allocation8 + $0x18] sm:$0xff]  ;;  %v178_v54 = vld [vmem:[#allocation8 + $0x8] sm:$0xff]  ;;  %v177_v55 = vld [vmem:[#allocation8] sm:$0xff] }
  0x24   :  { %117 = vmatpush.msra.mxu0 %v96_v14  ;;  %v245_v56 = vld [vmem:[%s454_s4] ss:$0 sm:$0xff] }
  0x25   :  { %161 = vmatpush.msra.mxu1 %v140_v25  ;;  %200 = vmatpush.msra.mxu2 %v189_v36  ;;  %v246_v63 = vld [vmem:[%s456_s6] ss:$0 sm:$0xff] }
  0x26   :  { %118 = vmatpush.msra.mxu0 %v95_v16 }
  0x27   :  { %162 = vmatpush.msra.mxu1 %v139_v26  ;;  %201 = vmatpush.msra.mxu2 %v188_v37 }
  0x28   :  { %119 = vmatpush.msra.mxu0 %v94_v18 }
  0x29   :  { %163 = vmatpush.msra.mxu1 %v138_v27  ;;  %202 = vmatpush.msra.mxu2 %v187_v38 }
  0x2a   :  { %120 = vmatpush.msra.mxu0 %v93_v19 }
  0x2b   :  { %164 = vmatpush.msra.mxu1 %v137_v28  ;;  %203 = vmatpush.msra.mxu2 %v186_v39 }
  0x2c   :  { %121 = vmatpush.msra.mxu0 %v92_v20 }
  0x2d   :  { %165 = vmatpush.msra.mxu1 %v136_v29  ;;  %204 = vmatpush.msra.mxu2 %v185_v40 }
  0x2e   :  { %122 = vmatpush.msra.mxu0 %v91_v21 }
  0x2f   :  { %166 = vmatpush.msra.mxu1 %v135_v30  ;;  %205 = vmatpush.msra.mxu2 %v184_v48 }
  0x30   :  { %123 = vmatpush.msra.mxu0 %v90_v22 }
  0x31   :  { %167 = vmatpush.msra.mxu1 %v134_v31  ;;  %206 = vmatpush.msra.mxu2 %v183_v49 }
  0x32   :  { %124 = vmatpush.msra.mxu0 %v89_v23 }
  0x33   :  { %125 = vmatmul.f32.vlgmr.msra.gmra.mxu0 %v88_v24  ;;  %168 = vmatpush.msra.mxu1 %v133_v32 }
  0x34   :  { %207 = vmatpush.msra.mxu2 %v182_v50 }
  0x36   :  { %208 = vmatpush.msra.mxu2 %v181_v51 }
  0x38   :  { %209 = vmatpush.msra.mxu2 %v180_v52 }
  0x3a   :  { %210 = vmatpush.msra.mxu2 %v179_v53 }
  0x3c   :  { %211 = vmatpush.msra.mxu2 %v178_v54 }
  0x3e   :  { %212 = vmatpush.msra.mxu2 %v177_v55 }
  0xb0   :  { %v126_v42 = vpop.f32.mrf.mxu0 }
  0xb1   :  { %v127_v43 = vadd.f32 %v244_v41, %v126_v42 }
  0xb3   :  { %v129_v44 = vmul.f32 0.5, %v127_v43 }
  0xb5   :  { %247 = vtanh.f32 %v129_v44 }
  0xbb   :  { %v248_v45 = vpop.eup %247 }
  0xbc   :  { %v131_v46 = vmul.f32 0.5, %v248_v45 }
  0xbe   :  { %v132_v47 = vadd.f32 0.5, %v131_v46 }
  0xc0   :  { %169 = vmatmul.f32.vlgmr.msra.gmra.mxu1 %v132_v47 }
 0x13d   :  { %v170_v57 = vpop.f32.mrf.mxu1 }
 0x13e   :  { %v171_v58 = vadd.f32 %v245_v56, %v170_v57 }
 0x140   :  { %v173_v59 = vmul.f32 0.5, %v171_v58 }
 0x142   :  { %249 = vtanh.f32 %v173_v59 }
 0x148   :  { %v250_v60 = vpop.eup %249 }
 0x149   :  { %v175_v61 = vmul.f32 0.5, %v250_v60 }
 0x14b   :  { %v176_v62 = vadd.f32 0.5, %v175_v61 }
 0x14d   :  { %213 = vmatmul.f32.vlgmr.msra.gmra.mxu2 %v176_v62 }
 0x1d0   :  { %v214_v0 = vpop.f32.mrf.mxu2 }
 0x1d1   :  { %v215_v1 = vadd.f32 %v246_v63, %v214_v0 }
 0x1d3   :  { %217 = vst [vmem:[#allocation10] sm:$0xff] %v215_v1 }
 0x1d4   :  { %228 = dma.vmem_to_hbm [thread:$0]  %s224_s25, 128, %s226_s28, [#allocation4]  }
 0x1d5   :  { %377 = dma.done.wait [#allocation4], 128  }
 0x1d6   :  { %378 = vsyncadd [#allocation4], 4294967168 }
 0x1d7   :  { %233 = vsyncpa [#allocation3], 1 }
 0x1d8   :  { %234 = vsyncpa [#allocation6], 1 }
 0x1d9   :  { %235 = vsyncpa [#allocation9], 1 }
 0x1da   :  { %236 = vsyncpa [#allocation4], 1 }

// kernel: tpu_custom_call.1
= control target key start
LH: loop header
LB: loop body
LE: loop exit
PB: predicated region body
PF: predicated region fallthrough
CT: control target
= control target key end

     0   :  { %12 = vsyncpa [#allocation3], 0  ;;  %s450_s0 = inlined_call_operand.hbm [shape: f32[8,128], index: 0, kind: input, shape index: {}]   ;;  %s451_s1 = inlined_call_operand.hbm [shape: f32[128,128], index: 1, kind: input, shape index: {}]   ;;  %s452_s2 = inlined_call_operand.vmem [shape: f32[1,128], index: 2, kind: input, shape index: {}]   ;;  %s453_s3 = inlined_call_operand.hbm [shape: f32[128,128], index: 3, kind: input, shape index: {}]   ;;  %s454_s4 = inlined_call_operand.vmem [shape: f32[1,128], index: 4, kind: input, shape index: {}]   ;;  %s455_s5 = inlined_call_operand.hbm [shape: f32[128,128], index: 5, kind: input, shape index: {}]   ;;  %s456_s6 = inlined_call_operand.vmem [shape: f32[1,128], index: 6, kind: input, shape index: {}]   ;;  %s457_s7 = inlined_call_operand.hbm [shape: f32[8,128], index: 7, kind: output, shape index: {}]  }
   0x1   :  { %13 = vsyncpa [#allocation6], 0 }
   0x2   :  { %14 = vsyncpa [#allocation9], 0  ;;  %s31_s26 = sshll.u32 %s451_s1, 4  ;;  %s32_s26 = int_to_ptr.hbm [resolvable:$true] %s31_s26 }
   0x3   :  { %15 = vsyncpa [#allocation4], 0  ;;  %s379_s27 = smov [#allocation5]   ;;  %s21_s8 = sshll.u32 %s450_s0, 4  ;;  %s22_s8 = int_to_ptr.hbm [resolvable:$true] %s21_s8 }
   0x4   :  { %s33_s28 = sshll.u32 %s379_s27, 4  ;;  %s380_s9 = smov 128   ;;  %s34_s28 = int_to_ptr.vmem [resolvable:$true] %s33_s28 }
   0x5   :  { %s381_s10 = smov 8   ;;  %s382_s11 = smov [#allocation2]  }
   0x6   :  { %39 = dma.hbm_to_vmem [thread:$0]  %s32_s26, 2048, %s34_s28, [#allocation6], %s380_s9, %s380_s9, %s381_s10  }
   0x7   :  { %s23_s12 = sshll.u32 %s382_s11, 4  ;;  %s46_s15 = sshll.u32 %s453_s3, 4  ;;  %s24_s12 = int_to_ptr.vmem [resolvable:$true] %s23_s12  ;;  %s47_s15 = int_to_ptr.hbm [resolvable:$true] %s46_s15 }
   0x8   :  { %26 = dma.hbm_to_vmem [thread:$0]  %s22_s8, 128, %s24_s12, [#allocation3]  }
   0x9   :  { %s61_s17 = sshll.u32 %s455_s5, 4  ;;  %s383_s18 = smov [#allocation7]   ;;  %s62_s17 = int_to_ptr.hbm [resolvable:$true] %s61_s17 }
   0xa   :  { %s48_s19 = sshll.u32 %s383_s18, 4  ;;  %s384_s0 = smov [#allocation8]   ;;  %s49_s19 = int_to_ptr.vmem [resolvable:$true] %s48_s19 }
   0xb   :  { %54 = dma.hbm_to_vmem [thread:$0]  %s47_s15, 2048, %s49_s19, [#allocation6], %s380_s9, %s380_s9, %s381_s10  }
   0xc   :  { %s63_s20 = sshll.u32 %s384_s0, 4  ;;  %s64_s20 = int_to_ptr.vmem [resolvable:$true] %s63_s20 }
   0xd   :  { %69 = dma.hbm_to_vmem [thread:$0]  %s62_s17, 2048, %s64_s20, [#allocation9], %s380_s9, %s380_s9, %s381_s10  }
   0xe   :  { %371 = dma.done.wait [#allocation3], 128  }
   0xf   :  { %372 = vsyncadd [#allocation3], 4294967168 }
  0x10   :  { %373 = dma.done.wait [#allocation6], 4096  }
  0x11   :  { %374 = vsyncadd [#allocation6], 4294963200 }
  0x12   :  { %375 = dma.done.wait [#allocation9], 2048  }
  0x13   :  { %376 = vsyncadd [#allocation9], 4294965248  ;;  %v104_v0 = vld [vmem:[#allocation5 + $0x78] sm:$0xff]  ;;  %v103_v1 = vld [vmem:[#allocation5 + $0x70] sm:$0xff]  ;;  %s385_s24 = smov [#allocation10]   ;;  %s225_s28 = sshll.u32 %s457_s7, 4  ;;  %s226_s28 = int_to_ptr.hbm [resolvable:$true] %s225_s28 }
  0x14   :  { %109 = vmatpush.msra.mxu0 %v104_v0  ;;  %v102_v2 = vld [vmem:[#allocation5 + $0x68] sm:$0xff]  ;;  %v101_v3 = vld [vmem:[#allocation5 + $0x60] sm:$0xff]  ;;  %v148_v4 = vld [vmem:[#allocation7 + $0x78] sm:$0xff]  ;;  %s223_s25 = sshll.u32 %s385_s24, 4  ;;  %s224_s25 = int_to_ptr.vmem [resolvable:$true] %s223_s25 }
  0x15   :  { %v100_v5 = vld [vmem:[#allocation5 + $0x58] sm:$0xff]  ;;  %153 = vmatpush.msra.mxu1 %v148_v4  ;;  %v147_v6 = vld [vmem:[#allocation7 + $0x70] sm:$0xff]  ;;  %v146_v7 = vld [vmem:[#allocation7 + $0x68] sm:$0xff] }
  0x16   :  { %110 = vmatpush.msra.mxu0 %v103_v1  ;;  %v99_v8 = vld [vmem:[#allocation5 + $0x50] sm:$0xff]  ;;  %v145_v9 = vld [vmem:[#allocation7 + $0x60] sm:$0xff]  ;;  %v98_v10 = vld [vmem:[#allocation5 + $0x48] sm:$0xff] }
  0x17   :  { %154 = vmatpush.msra.mxu1 %v147_v6  ;;  %v144_v11 = vld [vmem:[#allocation7 + $0x58] sm:$0xff]  ;;  %v97_v12 = vld [vmem:[#allocation5 + $0x40] sm:$0xff]  ;;  %v143_v13 = vld [vmem:[#allocation7 + $0x50] sm:$0xff] }
  0x18   :  { %111 = vmatpush.msra.mxu0 %v102_v2  ;;  %v96_v14 = vld [vmem:[#allocation5 + $0x38] sm:$0xff]  ;;  %v142_v15 = vld [vmem:[#allocation7 + $0x48] sm:$0xff]  ;;  %v95_v16 = vld [vmem:[#allocation5 + $0x30] sm:$0xff] }
  0x19   :  { %155 = vmatpush.msra.mxu1 %v146_v7  ;;  %v141_v17 = vld [vmem:[#allocation7 + $0x40] sm:$0xff]  ;;  %v94_v18 = vld [vmem:[#allocation5 + $0x28] sm:$0xff]  ;;  %v92_v20 = vld [vmem:[#allocation5 + $0x18] sm:$0xff] }
  0x1a   :  { %112 = vmatpush.msra.mxu0 %v101_v3  ;;  %v93_v19 = vld [vmem:[#allocation5 + $0x20] sm:$0xff]  ;;  %v91_v21 = vld [vmem:[#allocation5 + $0x10] sm:$0xff]  ;;  %v90_v22 = vld [vmem:[#allocation5 + $0x8] sm:$0xff] }
  0x1b   :  { %156 = vmatpush.msra.mxu1 %v145_v9  ;;  %v89_v23 = vld [vmem:[#allocation5] sm:$0xff]  ;;  %v88_v24 = vld [vmem:[#allocation2] sm:$0xff]  ;;  %v139_v26 = vld [vmem:[#allocation7 + $0x30] sm:$0xff] }
  0x1c   :  { %113 = vmatpush.msra.mxu0 %v100_v5  ;;  %v140_v25 = vld [vmem:[#allocation7 + $0x38] sm:$0xff]  ;;  %v138_v27 = vld [vmem:[#allocation7 + $0x28] sm:$0xff]  ;;  %v137_v28 = vld [vmem:[#allocation7 + $0x20] sm:$0xff] }
  0x1d   :  { %157 = vmatpush.msra.mxu1 %v144_v11  ;;  %v136_v29 = vld [vmem:[#allocation7 + $0x18] sm:$0xff]  ;;  %v135_v30 = vld [vmem:[#allocation7 + $0x10] sm:$0xff]  ;;  %v134_v31 = vld [vmem:[#allocation7 + $0x8] sm:$0xff] }
  0x1e   :  { %114 = vmatpush.msra.mxu0 %v99_v8  ;;  %v133_v32 = vld [vmem:[#allocation7] sm:$0xff]  ;;  %v192_v33 = vld [vmem:[#allocation8 + $0x78] sm:$0xff]  ;;  %v191_v34 = vld [vmem:[#allocation8 + $0x70] sm:$0xff] }
  0x1f   :  { %158 = vmatpush.msra.mxu1 %v143_v13  ;;  %197 = vmatpush.msra.mxu2 %v192_v33  ;;  %v190_v35 = vld [vmem:[#allocation8 + $0x68] sm:$0xff]  ;;  %v189_v36 = vld [vmem:[#allocation8 + $0x60] sm:$0xff]  ;;  %v188_v37 = vld [vmem:[#allocation8 + $0x58] sm:$0xff] }
  0x20   :  { %115 = vmatpush.msra.mxu0 %v98_v10  ;;  %v187_v38 = vld [vmem:[#allocation8 + $0x50] sm:$0xff]  ;;  %v186_v39 = vld [vmem:[#allocation8 + $0x48] sm:$0xff]  ;;  %v185_v40 = vld [vmem:[#allocation8 + $0x40] sm:$0xff] }
  0x21   :  { %159 = vmatpush.msra.mxu1 %v142_v15  ;;  %198 = vmatpush.msra.mxu2 %v191_v34  ;;  %v244_v41 = vld [vmem:[%s452_s2] ss:$0 sm:$0xff]  ;;  %v183_v49 = vld [vmem:[#allocation8 + $0x30] sm:$0xff]  ;;  %v182_v50 = vld [vmem:[#allocation8 + $0x28] sm:$0xff] }
  0x22   :  { %116 = vmatpush.msra.mxu0 %v97_v12  ;;  %v184_v48 = vld [vmem:[#allocation8 + $0x38] sm:$0xff]  ;;  %v181_v51 = vld [vmem:[#allocation8 + $0x20] sm:$0xff]  ;;  %v179_v53 = vld [vmem:[#allocation8 + $0x10] sm:$0xff] }
  0x23   :  { %160 = vmatpush.msra.mxu1 %v141_v17  ;;  %199 = vmatpush.msra.mxu2 %v190_v35  ;;  %v180_v52 = vld [vmem:[#allocation8 + $0x18] sm:$0xff]  ;;  %v178_v54 = vld [vmem:[#allocation8 + $0x8] sm:$0xff]  ;;  %v177_v55 = vld [vmem:[#allocation8] sm:$0xff] }
  0x24   :  { %117 = vmatpush.msra.mxu0 %v96_v14  ;;  %v245_v56 = vld [vmem:[%s454_s4] ss:$0 sm:$0xff] }
  0x25   :  { %161 = vmatpush.msra.mxu1 %v140_v25  ;;  %200 = vmatpush.msra.mxu2 %v189_v36  ;;  %v246_v63 = vld [vmem:[%s456_s6] ss:$0 sm:$0xff] }
  0x26   :  { %118 = vmatpush.msra.mxu0 %v95_v16 }
  0x27   :  { %162 = vmatpush.msra.mxu1 %v139_v26  ;;  %201 = vmatpush.msra.mxu2 %v188_v37 }
  0x28   :  { %119 = vmatpush.msra.mxu0 %v94_v18 }
  0x29   :  { %163 = vmatpush.msra.mxu1 %v138_v27  ;;  %202 = vmatpush.msra.mxu2 %v187_v38 }
  0x2a   :  { %120 = vmatpush.msra.mxu0 %v93_v19 }
  0x2b   :  { %164 = vmatpush.msra.mxu1 %v137_v28  ;;  %203 = vmatpush.msra.mxu2 %v186_v39 }
  0x2c   :  { %121 = vmatpush.msra.mxu0 %v92_v20 }
  0x2d   :  { %165 = vmatpush.msra.mxu1 %v136_v29  ;;  %204 = vmatpush.msra.mxu2 %v185_v40 }
  0x2e   :  { %122 = vmatpush.msra.mxu0 %v91_v21 }
  0x2f   :  { %166 = vmatpush.msra.mxu1 %v135_v30  ;;  %205 = vmatpush.msra.mxu2 %v184_v48 }
  0x30   :  { %123 = vmatpush.msra.mxu0 %v90_v22 }
  0x31   :  { %167 = vmatpush.msra.mxu1 %v134_v31  ;;  %206 = vmatpush.msra.mxu2 %v183_v49 }
  0x32   :  { %124 = vmatpush.msra.mxu0 %v89_v23 }
  0x33   :  { %125 = vmatmul.f32.vlgmr.msra.gmra.mxu0 %v88_v24  ;;  %168 = vmatpush.msra.mxu1 %v133_v32 }
  0x34   :  { %207 = vmatpush.msra.mxu2 %v182_v50 }
  0x36   :  { %208 = vmatpush.msra.mxu2 %v181_v51 }
  0x38   :  { %209 = vmatpush.msra.mxu2 %v180_v52 }
  0x3a   :  { %210 = vmatpush.msra.mxu2 %v179_v53 }
  0x3c   :  { %211 = vmatpush.msra.mxu2 %v178_v54 }
  0x3e   :  { %212 = vmatpush.msra.mxu2 %v177_v55 }
  0xb0   :  { %v126_v42 = vpop.f32.mrf.mxu0 }
  0xb1   :  { %v127_v43 = vadd.f32 %v244_v41, %v126_v42 }
  0xb3   :  { %v129_v44 = vmul.f32 0.5, %v127_v43 }
  0xb5   :  { %247 = vtanh.f32 %v129_v44 }
  0xbb   :  { %v248_v45 = vpop.eup %247 }
  0xbc   :  { %v131_v46 = vmul.f32 0.5, %v248_v45 }
  0xbe   :  { %v132_v47 = vadd.f32 0.5, %v131_v46 }
  0xc0   :  { %169 = vmatmul.f32.vlgmr.msra.gmra.mxu1 %v132_v47 }
 0x13d   :  { %v170_v57 = vpop.f32.mrf.mxu1 }
 0x13e   :  { %v171_v58 = vadd.f32 %v245_v56, %v170_v57 }
 0x140   :  { %v173_v59 = vmul.f32 0.5, %v171_v58 }
 0x142   :  { %249 = vtanh.f32 %v173_v59 }
 0x148   :  { %v250_v60 = vpop.eup %249 }
 0x149   :  { %v175_v61 = vmul.f32 0.5, %v250_v60 }
 0x14b   :  { %v176_v62 = vadd.f32 0.5, %v175_v61 }
 0x14d   :  { %213 = vmatmul.f32.vlgmr.msra.gmra.mxu2 %v176_v62 }
 0x1d0   :  { %v214_v0 = vpop.f32.mrf.mxu2 }
 0x1d1   :  { %v215_v1 = vadd.f32 %v246_v63, %v214_v0 }
 0x1d3   :  { %217 = vst [vmem:[#allocation10] sm:$0xff] %v215_v1 }
 0x1d4   :  { %228 = dma.vmem_to_hbm [thread:$0]  %s224_s25, 128, %s226_s28, [#allocation4]  }
 0x1d5   :  { %377 = dma.done.wait [#allocation4], 128  }
 0x1d6   :  { %378 = vsyncadd [#allocation4], 4294967168 }
 0x1d7   :  { %233 = vsyncpa [#allocation3], 1 }
 0x1d8   :  { %234 = vsyncpa [#allocation6], 1 }
 0x1d9   :  { %235 = vsyncpa [#allocation9], 1 }
 0x1da   :  { %236 = vsyncpa [#allocation4], 1 }

</bundles_post_ra>
